<compile_context>
chip_gen: v5e
topology: v5e:2x2
jax: 0.10.0
libtpu: 0.0.40
codegen_flags: <defaults>
</compile_context>

<pallas_src>
import functools

import numpy as np
import jax
import jax.numpy as jnp
from jax.experimental import pallas as pl
from jax.experimental.pallas import tpu as pltpu


def _round_up(x, m):
    return ((x + m - 1) // m) * m


def _fm_kernel(emb_ref, lin_ref, bias_ref, out_ref, *, num_fields, embed_dim):
    # emb_ref : (F*D, TB) f32   feature-major, batch on lanes (lane-dense)
    # lin_ref : (F,   TB) f32
    # bias_ref: (1,)      f32   in SMEM (scalar)
    # out_ref : (1,   TB) f32   lane-dense output slab
    x = emb_ref[...]

    # Field sum: accumulate the F aligned D-sublane slices (D % 8 == 0 here).
    sum_f = x[0:embed_dim, :]
    for f in range(1, num_fields):
        sum_f = sum_f + x[f * embed_dim:(f + 1) * embed_dim, :]

    square_of_sum = jnp.sum(sum_f * sum_f, axis=0, keepdims=True)   # (1, TB)
    sum_of_square = jnp.sum(x * x, axis=0, keepdims=True)           # (1, TB)
    fm = 0.5 * (square_of_sum - sum_of_square)                      # (1, TB)

    # FeaturesLinear: field-sum of per-index scalars + scalar bias.
    lin = jnp.sum(lin_ref[...], axis=0, keepdims=True)              # (1, TB)

    out_ref[...] = (lin + fm + bias_ref[0]).astype(out_ref.dtype)


def myfm_forward(fm_part, embed_weight, fc_weight, bias, offsets, *,
                 tile_b=1024):
    """fm_part: int32 (B, F); returns f32 (B, 1)."""
    B, F = fm_part.shape
    D = embed_weight.shape[1]

    # Glue: offset add + table gathers (data-dependent indexing) in XLA.
    idx = fm_part + offsets[None, :].astype(fm_part.dtype)          # (B, F)
    emb = embed_weight[idx]                                         # (B, F, D)
    lin = fc_weight[idx][..., 0]                                    # (B, F)

    # Feature-major, lane-dense layouts (batch on lanes).
    emb_t = jnp.transpose(emb, (1, 2, 0)).reshape(F * D, B)         # (F*D, B)
    lin_t = jnp.transpose(lin, (1, 0))                              # (F, B)

    # Tile the batch; TB is a multiple of 128 (lane-dense blocks), pad B.
    TB = min(tile_b, _round_up(B, 128))
    B_pad = _round_up(B, TB)
    if B_pad != B:
        emb_t = jnp.pad(emb_t, ((0, 0), (0, B_pad - B)))
        lin_t = jnp.pad(lin_t, ((0, 0), (0, B_pad - B)))
    num_tiles = B_pad // TB

    out = pl.pallas_call(
        functools.partial(_fm_kernel, num_fields=F, embed_dim=D),
        out_shape=jax.ShapeDtypeStruct((1, B_pad), jnp.float32),
        grid=(num_tiles,),
        in_specs=[
            pl.BlockSpec((F * D, TB), lambda i: (0, i)),
            pl.BlockSpec((F, TB), lambda i: (0, i)),
            pl.BlockSpec(memory_space=pltpu.MemorySpace.SMEM),
        ],
        out_specs=pl.BlockSpec((1, TB), lambda i: (0, i)),
        compiler_params=pltpu.CompilerParams(
            dimension_semantics=("parallel",)),
    )(emb_t.astype(jnp.float32), lin_t.astype(jnp.float32),
      bias.reshape(1).astype(jnp.float32))

    return out[0, :B].reshape(B, 1)


def _reference(fm_part, embed_weight, fc_weight, bias, offsets):
    idx = fm_part + offsets[None, :]
    e = embed_weight[idx]                                  # (B, F, D)
    sos = jnp.sum(e, axis=1) ** 2
    ssq = jnp.sum(e ** 2, axis=1)
    fm = 0.5 * jnp.sum(sos - ssq, axis=1, keepdims=True)
    lin = jnp.sum(fc_weight[idx], axis=1) + bias           # (B, 1)
    return lin + fm


if __name__ == "__main__":
    field_dims = (3, 5, 7, 9)          # num_fields = 4, vocab = 24
    embed_dim = 32
    batch = 8
    num_fields = len(field_dims)
    vocab = int(sum(field_dims))

    offsets = jnp.asarray(
        np.array((0, *np.cumsum(field_dims)[:-1]), dtype=np.int32))

    key = jax.random.PRNGKey(0)
    k_emb, k_fc, k_idx = jax.random.split(key, 3)

    # xavier_uniform_ for the embedding table: bound = sqrt(6 / (fan_in + fan_out))
    bound = float(np.sqrt(6.0 / (vocab + embed_dim)))
    embed_weight = jax.random.uniform(
        k_emb, (vocab, embed_dim), jnp.float32, minval=-bound, maxval=bound)
    # nn.Embedding default init (normal) for the linear table, deterministic here.
    fc_weight = jax.random.normal(k_fc, (vocab, 1), jnp.float32)
    bias = jnp.zeros((1,), jnp.float32)

    # Input: long tensor (batch, num_fields), each column indexes its own field.
    cols = []
    keys = jax.random.split(k_idx, num_fields)
    for f, kk in zip(field_dims, keys):
        cols.append(jax.random.randint(kk, (batch,), 0, f, jnp.int32))
    fm_part = jnp.stack(cols, axis=1)                      # (B, F) int32

    out = myfm_forward(fm_part, embed_weight, fc_weight, bias, offsets)
    out = jax.block_until_ready(out)

    ref = _reference(fm_part, embed_weight, fc_weight, bias, offsets)
    assert out.shape == (batch, 1)
    np.testing.assert_allclose(np.asarray(out), np.asarray(ref),
                               rtol=1e-5, atol=1e-5)
    print("KERNEL_OK")
</pallas_src>

<mosaic_0001>
module attributes {stable_mosaic.version = 11 : i64} {
  func.func @_fm_kernel(%arg0: i32, %arg1: memref<128x128xf32, #tpu.memory_space<vmem>>, %arg2: memref<4x128xf32, #tpu.memory_space<vmem>>, %arg3: memref<1xf32, #tpu.memory_space<smem>>, %arg4: memref<1x128xf32, #tpu.memory_space<vmem>>) attributes {dimension_semantics = [#tpu.dimension_semantics<parallel>], iteration_bounds = array<i64: 1>, scalar_prefetch = 0 : i64, scratch_operands = 0 : i64, tpu.core_type = #tpu.core_type<tc>, window_params = [{transform_indices = @transform_0, window_bounds = array<i64: 128, 128>}, {transform_indices = @transform_1, window_bounds = array<i64: 4, 128>}, {transform_indices = @transform_2, window_bounds = array<i64: 1>}, {transform_indices = @transform_3, window_bounds = array<i64: 1, 128>}]} {
    %c0 = arith.constant 0 : index
    %c0_0 = arith.constant 0 : index
    %0 = vector.load %arg1[%c0, %c0_0] : memref<128x128xf32, #tpu.memory_space<vmem>>, vector<128x128xf32>
    %1 = vector.extract_strided_slice %0 {offsets = [0, 0], sizes = [32, 128], strides = [1, 1]} : vector<128x128xf32> to vector<32x128xf32>
    %2 = vector.extract_strided_slice %0 {offsets = [32, 0], sizes = [32, 128], strides = [1, 1]} : vector<128x128xf32> to vector<32x128xf32>
    %3 = arith.addf %1, %2 : vector<32x128xf32>
    %4 = vector.extract_strided_slice %0 {offsets = [64, 0], sizes = [32, 128], strides = [1, 1]} : vector<128x128xf32> to vector<32x128xf32>
    %5 = arith.addf %3, %4 : vector<32x128xf32>
    %6 = vector.extract_strided_slice %0 {offsets = [96, 0], sizes = [32, 128], strides = [1, 1]} : vector<128x128xf32> to vector<32x128xf32>
    %7 = arith.addf %5, %6 : vector<32x128xf32>
    %8 = arith.mulf %7, %7 : vector<32x128xf32>
    %cst = arith.constant dense<0.000000e+00> : vector<128xf32>
    %9 = vector.multi_reduction <add>, %8, %cst [0] : vector<32x128xf32> to vector<128xf32>
    %10 = vector.shape_cast %9 : vector<128xf32> to vector<1x128xf32>
    %11 = arith.mulf %0, %0 : vector<128x128xf32>
    %cst_1 = arith.constant dense<0.000000e+00> : vector<128xf32>
    %12 = vector.multi_reduction <add>, %11, %cst_1 [0] : vector<128x128xf32> to vector<128xf32>
    %13 = vector.shape_cast %12 : vector<128xf32> to vector<1x128xf32>
    %14 = arith.subf %10, %13 : vector<1x128xf32>
    %cst_2 = arith.constant 5.000000e-01 : f32
    %15 = vector.broadcast %cst_2 : f32 to vector<1x128xf32>
    %16 = arith.mulf %15, %14 : vector<1x128xf32>
    %c0_3 = arith.constant 0 : index
    %c0_4 = arith.constant 0 : index
    %17 = vector.load %arg2[%c0_3, %c0_4] : memref<4x128xf32, #tpu.memory_space<vmem>>, vector<4x128xf32>
    %cst_5 = arith.constant dense<0.000000e+00> : vector<128xf32>
    %18 = vector.multi_reduction <add>, %17, %cst_5 [0] : vector<4x128xf32> to vector<128xf32>
    %19 = vector.shape_cast %18 : vector<128xf32> to vector<1x128xf32>
    %20 = arith.addf %19, %16 : vector<1x128xf32>
    %c0_6 = arith.constant 0 : index
    %21 = memref.load %arg3[%c0_6] : memref<1xf32, #tpu.memory_space<smem>>
    %22 = vector.broadcast %21 : f32 to vector<1x128xf32>
    %23 = arith.addf %20, %22 : vector<1x128xf32>
    %c0_7 = arith.constant 0 : index
    %c0_8 = arith.constant 0 : index
    %24 = vector.load %arg4[%c0_7, %c0_8] : memref<1x128xf32, #tpu.memory_space<vmem>>, vector<1x128xf32>
    tpu.vector_store %arg4[%c0_7, %c0_8], %23 {strides = array<i32>} : memref<1x128xf32, #tpu.memory_space<vmem>>, vector<1x128xf32>,
    return
  }
  func.func @transform_0(%arg0: i32) -> (i32, i32) {
    %c0_i32 = arith.constant 0 : i32
    %c0_i32_0 = arith.constant 0 : i32
    return %c0_i32, %arg0 : i32, i32
  }
  func.func @transform_1(%arg0: i32) -> (i32, i32) {
    %c0_i32 = arith.constant 0 : i32
    %c0_i32_0 = arith.constant 0 : i32
    return %c0_i32, %arg0 : i32, i32
  }
  func.func @transform_2(%arg0: i32) -> i32 {
    %c0_i32 = arith.constant 0 : i32
    %c0_i32_0 = arith.constant 0 : i32
    return %c0_i32 : i32
  }
  func.func @transform_3(%arg0: i32) -> (i32, i32) {
    %c0_i32 = arith.constant 0 : i32
    %c0_i32_0 = arith.constant 0 : i32
    return %c0_i32, %arg0 : i32, i32
  }
}

</mosaic_0001>

<bundles_post_ra>
// kernel: tpu_custom_call.1
= control target key start
LH: loop header
LB: loop body
LE: loop exit
PB: predicated region body
PF: predicated region fallthrough
CT: control target
= control target key end

     0   :  { %9 = vsyncpa [#allocation4], 0  ;;  %s278_s0 = inlined_call_operand.hbm [shape: f32[128,128], index: 0, kind: input, shape index: {}]   ;;  %s279_s1 = inlined_call_operand.hbm [shape: f32[4,128], index: 1, kind: input, shape index: {}]   ;;  %s280_s2 = inlined_call_operand.<no memory space> [shape: f32[1], index: 2, kind: input, shape index: {}]   ;;  %s281_s3 = inlined_call_operand.hbm [shape: f32[1,128], index: 3, kind: output, shape index: {}]  }
   0x1   :  { %10 = vsyncpa [#allocation7], 0 }
   0x2   :  { %11 = vsyncpa [#allocation5], 0  ;;  %s16_s14 = sshll.u32 %s278_s0, 4  ;;  %s241_s15 = smov [#allocation3]   ;;  %s17_s14 = int_to_ptr.hbm [resolvable:$true] %s16_s14 }
   0x3   :  { %s18_s16 = sshll.u32 %s241_s15, 4  ;;  %s30_s19 = sshll.u32 %s279_s1, 4  ;;  %s19_s16 = int_to_ptr.vmem [resolvable:$true] %s18_s16  ;;  %s31_s19 = int_to_ptr.hbm [resolvable:$true] %s30_s19 }
   0x4   :  { %s242_s20 = smov 128   ;;  %s243_s21 = smov 8  }
   0x5   :  { %24 = dma.hbm_to_vmem [thread:$0]  %s17_s14, 2048, %s19_s16, [#allocation4], %s242_s20, %s242_s20, %s243_s21  }
   0x6   :  { %s244_s22 = smov [#allocation6]  }
   0x7   :  { %s32_s23 = sshll.u32 %s244_s22, 4  ;;  %s33_s23 = int_to_ptr.vmem [resolvable:$true] %s32_s23 }
   0x8   :  { %35 = dma.hbm_to_vmem [thread:$0]  %s31_s19, 64, %s33_s23, [#allocation7]  }
   0x9   :  { %235 = dma.done.wait [#allocation4], 2048  }
   0xa   :  { %236 = vsyncadd [#allocation4], 4294965248 }
   0xb   :  { %237 = dma.done.wait [#allocation7], 64  }
   0xc   :  { %238 = vsyncadd [#allocation7], 4294967232  ;;  %v46_v0 = vld [vmem:[#allocation3] sm:$0xff]  ;;  %v47_v1 = vld [vmem:[#allocation3 + $0x8] sm:$0xff]  ;;  %vm127_vm0 = vcmask 1043456   ;;  %s245_s24 = smov [#allocation8]  }
   0xd   :  { %v50_v2 = vld [vmem:[#allocation3 + $0x20] sm:$0xff]  ;;  %v51_v3 = vld [vmem:[#allocation3 + $0x28] sm:$0xff]  ;;  %v48_v4 = vld [vmem:[#allocation3 + $0x10] sm:$0xff]  ;;  %v87_v17 = vmul.f32 %v46_v0, %v46_v0  ;;  %v88_v18 = vmul.f32 %v47_v1, %v47_v1  ;;  %s145_s25 = sshll.u32 %s245_s24, 4  ;;  %s147_s28 = sshll.u32 %s281_s3, 4  ;;  %s146_s25 = int_to_ptr.vmem [resolvable:$true] %s145_s25  ;;  %s148_s28 = int_to_ptr.hbm [resolvable:$true] %s147_s28 }
   0xe   :  { %v52_v5 = vld [vmem:[#allocation3 + $0x30] sm:$0xff]  ;;  %v62_v6 = vadd.f32 %v50_v2, %v46_v0  ;;  %v63_v7 = vadd.f32 %v51_v3, %v47_v1  ;;  %v49_v8 = vld [vmem:[#allocation3 + $0x18] sm:$0xff]  ;;  %v54_v9 = vld [vmem:[#allocation3 + $0x40] sm:$0xff]  ;;  %v89_v24 = vmul.f32 %v48_v4, %v48_v4  ;;  %v91_v30 = vmul.f32 %v50_v2, %v50_v2 }
   0xf   :  { %v55_v10 = vld [vmem:[#allocation3 + $0x48] sm:$0xff]  ;;  %v64_v11 = vadd.f32 %v52_v5, %v48_v4  ;;  %v53_v12 = vld [vmem:[#allocation3 + $0x38] sm:$0xff]  ;;  %v58_v13 = vld [vmem:[#allocation3 + $0x60] sm:$0xff]  ;;  %v90_v27 = vmul.f32 %v49_v8, %v49_v8  ;;  %v103_v28 = vadd.f32 %v88_v18, %v87_v17  ;;  %v92_v36 = vmul.f32 %v51_v3, %v51_v3 }
  0x10   :  { %v59_v14 = vld [vmem:[#allocation3 + $0x68] sm:$0xff]  ;;  %v66_v15 = vadd.f32 %v62_v6, %v54_v9  ;;  %v67_v16 = vadd.f32 %v63_v7, %v55_v10  ;;  %v56_v19 = vld [vmem:[#allocation3 + $0x50] sm:$0xff]  ;;  %v65_v20 = vadd.f32 %v53_v12, %v49_v8  ;;  %v57_v26 = vld [vmem:[#allocation3 + $0x58] sm:$0xff]  ;;  %v93_v38 = vmul.f32 %v52_v5, %v52_v5 }
  0x11   :  { %v68_v21 = vadd.f32 %v64_v11, %v56_v19  ;;  %v60_v25 = vld [vmem:[#allocation3 + $0x70] sm:$0xff]  ;;  %v104_v34 = vadd.f32 %v103_v28, %v89_v24  ;;  %v61_v35 = vld [vmem:[#allocation3 + $0x78] sm:$0xff]  ;;  %v94_v43 = vmul.f32 %v53_v12, %v53_v12  ;;  %v95_v47 = vmul.f32 %v54_v9, %v54_v9  ;;  %v126_v56 = vld [vmem:[#allocation6] sm:$0xf] }
  0x12   :  { %v70_v22 = vadd.f32 %v66_v15, %v58_v13  ;;  %v71_v23 = vadd.f32 %v67_v16, %v59_v14  ;;  %v69_v29 = vadd.f32 %v65_v20, %v57_v26  ;;  %v96_v49 = vmul.f32 %v55_v10, %v55_v10 }
  0x13   :  { %v72_v31 = vadd.f32 %v68_v21, %v60_v25  ;;  %v105_v37 = vadd.f32 %v104_v34, %v90_v27  ;;  %v97_v52 = vmul.f32 %v56_v19, %v56_v19  ;;  %v98_v54 = vmul.f32 %v57_v26, %v57_v26 }
  0x14   :  { %v74_v32 = vmul.f32 %v70_v22, %v70_v22  ;;  %v75_v33 = vmul.f32 %v71_v23, %v71_v23  ;;  %v73_v39 = vadd.f32 %v69_v29, %v61_v35  ;;  %v99_v58 = vmul.f32 %v58_v13, %v58_v13 }
  0x15   :  { %v76_v40 = vmul.f32 %v72_v31, %v72_v31  ;;  %v106_v42 = vadd.f32 %v105_v37, %v91_v30  ;;  %v128_v60 = vsel %vm127_vm0, %v126_v56, 0.0  ;;  %v100_v61 = vmul.f32 %v59_v14, %v59_v14 }
  0x16   :  { %v78_v41 = vadd.f32 %v75_v33, %v74_v32  ;;  %v77_v45 = vmul.f32 %v73_v39, %v73_v39  ;;  %v101_v0 = vmul.f32 %v60_v25, %v60_v25  ;;  %v129_v2 = vrot.slane %v128_v60, 4 }
  0x17   :  { %v107_v44 = vadd.f32 %v106_v42, %v92_v36  ;;  %v102_v3 = vmul.f32 %v61_v35, %v61_v35  ;;  %v137_v24 = vstv %s280_s2 }
  0x18   :  { %v79_v46 = vadd.f32 %v78_v41, %v76_v40  ;;  %v130_v7 = vadd.f32 %v129_v2, %v128_v60 }
  0x19   :  { %v108_v48 = vadd.f32 %v107_v44, %v93_v38 }
  0x1a   :  { %v80_v51 = vadd.f32 %v79_v46, %v77_v45  ;;  %v131_v11 = vrot.slane %v130_v7, 2 }
  0x1b   :  { %v109_v50 = vadd.f32 %v108_v48, %v94_v43 }
  0x1c   :  { %v81_v57 = vrot.slane %v80_v51, 4  ;;  %v132_v16 = vadd.f32 %v131_v11, %v130_v7 }
  0x1d   :  { %v110_v53 = vadd.f32 %v109_v50, %v95_v47 }
  0x1e   :  { %v82_v63 = vadd.f32 %v81_v57, %v80_v51  ;;  %v133_v19 = vrot.slane %v132_v16, 1 }
  0x1f   :  { %v111_v55 = vadd.f32 %v110_v53, %v96_v49 }
  0x20   :  { %v83_v5 = vrot.slane %v82_v63, 2  ;;  %v134_v22 = vadd.f32 %v133_v19, %v132_v16 }
  0x21   :  { %v112_v59 = vadd.f32 %v111_v55, %v97_v52 }
  0x22   :  { %v84_v9 = vadd.f32 %v83_v5, %v82_v63 }
  0x23   :  { %v113_v62 = vadd.f32 %v112_v59, %v98_v54 }
  0x24   :  { %v85_v15 = vrot.slane %v84_v9, 1 }
  0x25   :  { %v114_v1 = vadd.f32 %v113_v62, %v99_v58 }
  0x26   :  { %v86_v14 = vadd.f32 %v85_v15, %v84_v9 }
  0x27   :  { %v115_v4 = vadd.f32 %v114_v1, %v100_v61 }
  0x29   :  { %v116_v6 = vadd.f32 %v115_v4, %v101_v0 }
  0x2b   :  { %v117_v8 = vadd.f32 %v116_v6, %v102_v3 }
  0x2d   :  { %v118_v10 = vrot.slane %v117_v8, 4 }
  0x2f   :  { %v119_v12 = vadd.f32 %v118_v10, %v117_v8 }
  0x31   :  { %v120_v13 = vrot.slane %v119_v12, 2 }
  0x33   :  { %v121_v17 = vadd.f32 %v120_v13, %v119_v12 }
  0x35   :  { %v122_v18 = vrot.slane %v121_v17, 1 }
  0x37   :  { %v123_v20 = vadd.f32 %v122_v18, %v121_v17 }
  0x39   :  { %v124_v21 = vsub.f32 %v86_v14, %v123_v20 }
  0x3b   :  { %v125_v23 = vmul.f32 0.5, %v124_v21 }
  0x3d   :  { %v135_v25 = vadd.f32 %v134_v22, %v125_v23 }
  0x3f   :  { %v138_v26 = vadd.f32 %v137_v24, %v135_v25 }
  0x41   :  { %139 = vst [vmem:[#allocation8] sm:$0x1] %v138_v26 }
  0x42   :  { %150 = dma.vmem_to_hbm [thread:$0]  %s146_s25, 16, %s148_s28, [#allocation5]  }
  0x43   :  { %239 = dma.done.wait [#allocation5], 16  }
  0x44   :  { %240 = vsyncadd [#allocation5], 4294967280 }
  0x45   :  { %155 = vsyncpa [#allocation4], 1 }
  0x46   :  { %156 = vsyncpa [#allocation7], 1 }
  0x47   :  { %157 = vsyncpa [#allocation5], 1 }

</bundles_post_ra>
